<compile_context>
chip_gen: v6e
topology: v6e:2x2x1
jax: 0.10.0
libtpu: 0.0.40
codegen_flags: <defaults>
</compile_context>

<pallas_src>
import jax
import jax.numpy as jnp
from jax.experimental import pallas as pl
from jax.experimental.pallas import tpu as pltpu


def _chomp_kernel(x_ref, o_ref):
    # x_ref: (R, L_in) block, o_ref: (R, L_out) block with L_out <= L_in.
    l_out = o_ref.shape[-1]
    o_ref[...] = x_ref[:, :l_out]


def chomp1d(x: jax.Array, chomp_size: int) -> jax.Array:
    """Pallas equivalent of Chomp1d.forward: x[:, :, :-chomp_size].contiguous()."""
    assert x.ndim == 3, "Chomp1d expects (N, C, L) input"
    n, c, l = x.shape
    assert 0 < chomp_size < l, "chomp_size must be in (0, L)"
    l_out = l - chomp_size

    # Flatten batch x channel into a single row axis; time stays the lane axis.
    rows = n * c
    x2 = x.reshape(rows, l)

    itemsize = jnp.dtype(x.dtype).itemsize
    # Sublane packing multiple: 8 for 32-bit, 16 for bf16, 32 for int8/fp8.
    sub = max(8, 32 // itemsize)

    # Skip DMA-ing the chomped tail only when the resulting block last-dim is
    # still legal under the (8,128) tiling rule (multiple of 128). Otherwise
    # read the full L and slice in-register.
    in_l = l_out if (l_out % 128 == 0) else l

    # Row block: as large as possible while keeping double-buffered input +
    # output tiles under ~16 MiB (fits every generation, incl. v7x 64 MiB VMEM
    # and v5e's small scoped default), capped at 1024 rows.
    tile_budget_bytes = 16 * 1024 * 1024
    bytes_per_row_dbuf = (in_l + l_out) * itemsize * 2  # x2: double buffering
    r = max(sub, min(1024, tile_budget_bytes // max(1, bytes_per_row_dbuf)))
    r = (r // sub) * sub
    # Don't exceed the (sublane-padded) number of rows.
    r = min(r, ((rows + sub - 1) // sub) * sub)
    r = max(r, sub)

    grid = (pl.cdiv(rows, r),)

    out2 = pl.pallas_call(
        _chomp_kernel,
        out_shape=jax.ShapeDtypeStruct((rows, l_out), x.dtype),
        grid_spec=pltpu.PrefetchScalarGridSpec(
            num_scalar_prefetch=0,
            grid=grid,
            in_specs=[
                # Last dim is either the full array extent (l) or a 128-multiple
                # (l_out); row dim is a multiple of the sublane packing.
                pl.BlockSpec((r, in_l), lambda i: (i, 0)),
            ],
            out_specs=pl.BlockSpec((r, l_out), lambda i: (i, 0)),
        ),
        compiler_params=pltpu.CompilerParams(
            # Row axis is independent -> shard across v7x's 2 TensorCores.
            dimension_semantics=("parallel",),
            # Explicit limit: >2x our tile budget, safe on all generations
            # (raises v5e's 16 MiB scoped default, stays under v7x physical).
            vmem_limit_bytes=32 * 1024 * 1024,
        ),
    )(x2)

    return out2.reshape(n, c, l_out)


if __name__ == "__main__":
    # Small deterministic example consistent with a TCN residual-block usage:
    # batch=2, channels=4, seq_len=16, chomp_size=2 (== causal padding).
    key = jax.random.PRNGKey(0)
    N, C, L = 2, 4, 16
    chomp_size = 2

    x = jax.random.normal(key, (N, C, L), dtype=jnp.float32)

    y = chomp1d(x, chomp_size)
    y = jax.block_until_ready(y)

    # Verify against the plain-JAX reference of the PyTorch semantics.
    y_ref = x[:, :, :-chomp_size]
    assert y.shape == (N, C, L - chomp_size), y.shape
    assert y.dtype == x.dtype
    assert jnp.array_equal(y, y_ref), "mismatch vs reference slice"

    print("KERNEL_OK")
</pallas_src>

<mosaic_0001>
module attributes {stable_mosaic.version = 11 : i64} {
  func.func @_chomp_kernel(%arg0: i32, %arg1: memref<8x16xf32, #tpu.memory_space<vmem>>, %arg2: memref<8x14xf32, #tpu.memory_space<vmem>>) attributes {dimension_semantics = [#tpu.dimension_semantics<parallel>], iteration_bounds = array<i64: 1>, scalar_prefetch = 0 : i64, scratch_operands = 0 : i64, tpu.core_type = #tpu.core_type<tc>, window_params = [{transform_indices = @transform_0, window_bounds = array<i64: 8, 16>}, {transform_indices = @transform_1, window_bounds = array<i64: 8, 14>}]} {
    %c0 = arith.constant 0 : index
    %c0_0 = arith.constant 0 : index
    %0 = vector.load %arg1[%c0, %c0_0] : memref<8x16xf32, #tpu.memory_space<vmem>>, vector<8x14xf32>
    %c0_1 = arith.constant 0 : index
    %c0_2 = arith.constant 0 : index
    %1 = vector.load %arg2[%c0_1, %c0_2] : memref<8x14xf32, #tpu.memory_space<vmem>>, vector<8x14xf32>
    tpu.vector_store %arg2[%c0_1, %c0_2], %0 {strides = array<i32>} : memref<8x14xf32, #tpu.memory_space<vmem>>, vector<8x14xf32>,
    return
  }
  func.func @transform_0(%arg0: i32) -> (i32, i32) {
    %c0_i32 = arith.constant 0 : i32
    %c0_i32_0 = arith.constant 0 : i32
    return %arg0, %c0_i32 : i32, i32
  }
  func.func @transform_1(%arg0: i32) -> (i32, i32) {
    %c0_i32 = arith.constant 0 : i32
    %c0_i32_0 = arith.constant 0 : i32
    return %arg0, %c0_i32 : i32, i32
  }
}

</mosaic_0001>

<bundles_post_ra>
// kernel: tpu_custom_call.1
= control target key start
LH: loop header
LB: loop body
LE: loop exit
PB: predicated region body
PF: predicated region fallthrough
CT: control target
= control target key end

     0   :  { %6 = vsyncpa [#allocation3], 0  ;;  %s103_s0 = inlined_call_operand.hbm [shape: f32[8,16], index: 0, kind: input, shape index: {}]   ;;  %s104_s1 = inlined_call_operand.hbm [shape: f32[8,14], index: 1, kind: output, shape index: {}]  }
   0x1   :  { %7 = vsyncpa [#allocation4], 0  ;;  %s85_s6 = smov [#allocation2]  }
   0x2   :  { %s14_s7 = sshll.u32 %s85_s6, 4  ;;  %s15_s7 = int_to_ptr.vmem [resolvable:$true] %s14_s7 }
   0x3   :  { %s49_s8 = scalar_lea.vmem %s15_s7, 128  ;;  %p54_p1 = scmp.lt.s32.totalorder %s15_s7, %s15_s7 }
   0x4   :  { %p50_p0 = scmp.ne.s32.totalorder %s15_s7, %s49_s8  ;;  %p55_p2 = scmp.lt.s32.totalorder %s49_s8, %s49_s8 }
   0x6   :  { %p56_p3 = por %p55_p2, %p54_p1 }
   0x8   :  { %p57_p4 = pnand %p56_p3, %p50_p0 }
   0xa   :  { %60 = shalt.err (!%p57_p4)
}
   0xb   :  { %17 = dma.hbm_to_vmem [thread:$0]  %s103_s0, 128, %s15_s7, [#allocation3]  }
   0xc   :  { %81 = dma.done.wait [#allocation3], 128  }
   0xd   :  { %82 = vsyncadd [#allocation3], 4294967168  ;;  %s86_s11 = smov [#allocation5]   ;;  %vm22_vm0 = vcmask 113664   ;;  %v21_v0 = vld [vmem:[#allocation2] sm:$0xff] }
   0xe   :  { %s30_s12 = sshll.u32 %s86_s11, 4  ;;  %23 = vst.msk [vmem:[#allocation5] sm:$0xff] %vm22_vm0, %v21_v0  ;;  %s31_s12 = int_to_ptr.vmem [resolvable:$true] %s30_s12 }
   0xf   :  { %s61_s13 = scalar_lea.vmem %s31_s12, 128  ;;  %p66_p6 = scmp.lt.s32.totalorder %s31_s12, %s31_s12 }
  0x10   :  { %p62_p5 = scmp.ne.s32.totalorder %s31_s12, %s61_s13  ;;  %p67_p7 = scmp.lt.s32.totalorder %s61_s13, %s61_s13 }
  0x12   :  { %p68_p8 = por %p67_p7, %p66_p6 }
  0x14   :  { %p69_p9 = pnand %p68_p8, %p62_p5 }
  0x16   :  { %72 = shalt.err (!%p69_p9)
}
  0x17   :  { %33 = dma.vmem_to_hbm [thread:$0]  %s31_s12, 128, %s104_s1, [#allocation4]  }
  0x18   :  { %83 = dma.done.wait [#allocation4], 128  }
  0x19   :  { %84 = vsyncadd [#allocation4], 4294967168 }
  0x1a   :  { %37 = vsyncpa [#allocation3], 1 }
  0x1b   :  { %38 = vsyncpa [#allocation4], 1 }

</bundles_post_ra>
